<compile_context>
chip_gen: v7x
topology: tpu7x:2x2x1
jax: 0.10.0
libtpu: 0.0.40
codegen_flags: <defaults>
</compile_context>

<pallas_src>
import functools

import jax
import jax.numpy as jnp
from jax import lax
from jax.experimental import pallas as pl
from jax.experimental.pallas import tpu as pltpu


# ----------------------------------------------------------------------------
# in-kernel helpers
# ----------------------------------------------------------------------------
def _outer_matmul(a, b):
    """(p,q)@(q,r) as q broadcast-FMA terms on the VPU.

    The contraction dims here are 4/8 (~1% of an MXU tile), so this avoids two
    serialized MXU push/pop round trips on the critical path.
    """
    q = a.shape[1]
    acc = a[:, 0:1] * b[0:1, :]
    for j in range(1, q):
        acc = acc + a[:, j:j + 1] * b[j:j + 1, :]
    return acc


# ----------------------------------------------------------------------------
# kernels
# ----------------------------------------------------------------------------
def _single_kernel(p_ref, kg_ref, h_ref, out_ref):
    P = p_ref[...]
    KG = kg_ref[...]
    H = h_ref[...]
    n = P.shape[0]

    # A = P - KG @ (H @ P) on the VPU (tiny contraction dims).
    A = P - _outer_matmul(KG, _outer_matmul(H, P))

    # Reverse-order unpivoted elimination.  It preserves det of every trailing
    # principal block, so afterwards  prod_{j>=m} diag[j] == det(A[m:, m:]),
    # hence  -log det(inv(A)[:3,:3]) = log(det(A)/det(A[3:,3:]))
    #                                = log(diag[0]*diag[1]*diag[2]).
    row_idx = lax.broadcasted_iota(jnp.int32, (n, n), 0)
    col_idx = lax.broadcasted_iota(jnp.int32, (n, n), 1)
    for k in range(n - 1, 0, -1):
        piv = A[k:k + 1, k:k + 1]          # (1,1) current pivot
        colk = A[:, k:k + 1]               # (n,1) elimination factors
        rowk = A[k:k + 1, :]               # (1,n) pivot row
        # one exact scalar divide per step: negligible cost, full f32 accuracy
        # for the (possibly ill-conditioned) Kalman posterior matrix.
        upd = A - colk * (rowk * (1.0 / piv))
        A = jnp.where(row_idx < k, upd, A)

    diag3 = (row_idx == col_idx) & (row_idx < 3)
    out_ref[...] = jnp.sum(jnp.log(jnp.where(diag3, A, 1.0)),
                           axis=(0, 1), keepdims=True)


def _sequential_kernel(x_ref, g_ref, out_ref, *, n, inv_b):
    """Lane-packed batch elimination.

    x_ref block: (n, blk_b*n) with X[i, b*n+j] = A_b[i, j]  (batch along lanes).
    g_ref block: (blk_b*n, blk_b*n) block-diagonal ones; X_masked @ G broadcasts
    a per-group value (one lane per group) to all n lanes of its group.
    """
    step = pl.program_id(0)
    X = x_ref[...]
    G = g_ref[...]
    lanes = X.shape[1]

    row_idx = lax.broadcasted_iota(jnp.int32, (n, lanes), 0)
    lane_off = lax.broadcasted_iota(jnp.int32, (n, lanes), 1) % n

    for k in range(n - 1, 0, -1):
        # column k of every batch, broadcast across that batch's n lanes
        colk = jnp.where(lane_off == k, X, 0.0)
        colk_bc = jnp.dot(colk, G, preferred_element_type=jnp.float32)
        rowk = X[k:k + 1, :]                       # pivot rows (all batches)
        piv_bc = colk_bc[k:k + 1, :]               # pivots, group-broadcast
        upd = X - colk_bc * (rowk * pl.reciprocal(piv_bc, approx=True))
        X = jnp.where(row_idx < k, upd, X)

    # sum_b (log d0 + log d1 + log d2): the d's sit on each group's diagonal.
    diag3 = (lane_off == row_idx) & (row_idx < 3)
    partial = jnp.sum(jnp.log(jnp.where(diag3, X, 1.0)),
                      axis=(0, 1), keepdims=True)

    @pl.when(step == 0)
    def _():
        out_ref[...] = jnp.zeros_like(out_ref)

    out_ref[...] += partial

    @pl.when(step == pl.num_programs(0) - 1)
    def _():
        out_ref[...] = out_ref[...] * inv_b        # mean: multiply by 1/B


# ----------------------------------------------------------------------------
# wrappers
# ----------------------------------------------------------------------------
def information_theoretic_cost(args, mode="single", weight=1):
    # NOTE: `weight` is stored by the torch module but unused in forward().
    # NOTE: if this cost is evaluated per KF timestep, batch the timesteps into
    # 'sequential' mode (one pallas_call) to amortize launch overhead.
    del weight
    vmem = pl.BlockSpec(memory_space=pltpu.MemorySpace.VMEM)

    if mode == "single":
        P = args["m2x_prior"].astype(jnp.float32)
        KG = args["KG"].astype(jnp.float32)
        H = args["jac_H"].astype(jnp.float32)
        out = pl.pallas_call(
            _single_kernel,
            out_shape=jax.ShapeDtypeStruct((1, 1), jnp.float32),
            in_specs=[vmem, vmem, vmem],
            out_specs=vmem,
        )(P, KG, H)
        return out[0, 0]

    if mode == "sequential":
        P = args["m2x_posterior"].astype(jnp.float32)
        B, n, _ = P.shape

        # batch block size: fill the 128-lane vreg (16 matrices for n=8)
        blk_b = max(1, 128 // n)
        if (blk_b * n) % 128 != 0:
            blk_b = B                      # fall back: one full-width block
        b_pad = ((B + blk_b - 1) // blk_b) * blk_b
        if b_pad > B:
            # identity pads: their pivots are 1 -> contribute exactly 0.
            pad = jnp.broadcast_to(jnp.eye(n, dtype=jnp.float32),
                                   (b_pad - B, n, n))
            P = jnp.concatenate([P, pad], axis=0)

        # lane-dense packing: (B,n,n) -> (n, B*n) with packed[i, b*n+j] = P[b,i,j]
        packed = jnp.transpose(P, (1, 0, 2)).reshape(n, b_pad * n)

        lanes = blk_b * n
        grp = jnp.arange(lanes, dtype=jnp.int32) // n
        G = (grp[:, None] == grp[None, :]).astype(jnp.float32)  # group broadcast

        n_blocks = b_pad // blk_b
        kernel = functools.partial(_sequential_kernel, n=n, inv_b=1.0 / B)
        out = pl.pallas_call(
            kernel,
            out_shape=jax.ShapeDtypeStruct((1, 1), jnp.float32),
            grid=(n_blocks,),
            in_specs=[pl.BlockSpec((n, lanes), lambda i: (0, i)),
                      pl.BlockSpec((lanes, lanes), lambda i: (0, 0))],
            out_specs=pl.BlockSpec((1, 1), lambda i: (0, 0)),
            compiler_params=pltpu.CompilerParams(
                dimension_semantics=("arbitrary",)),
        )(packed, G)
        return out[0, 0]

    # TODO(synk): 'batch_sequential' is `pass` (no-op) in the reference module.
    return None


# pure-JAX references (correctness check only)
def _ref_single(args):
    a = args["m2x_prior"] - args["KG"] @ (args["jac_H"] @ args["m2x_prior"])
    inv3 = jnp.linalg.inv(a)[:3, :3]
    return -jnp.log(jnp.linalg.det(inv3))


def _ref_sequential(args):
    inv3 = jnp.linalg.inv(args["m2x_posterior"])[:, :3, :3]
    return jnp.mean(-jnp.log(jnp.linalg.det(inv3)))


# ----------------------------------------------------------------------------
# main
# ----------------------------------------------------------------------------
if __name__ == "__main__":
    key = jax.random.PRNGKey(0)
    n, m, B = 8, 4, 4  # state dim, observation dim, batch (sequential mode)

    k1, k2, k3, k4 = jax.random.split(key, 4)

    # Kalman-filter-like, well-conditioned inputs (deterministic).
    L = jax.random.normal(k1, (n, n), dtype=jnp.float32)
    P = L @ L.T + n * jnp.eye(n, dtype=jnp.float32)              # SPD prior cov
    H = jax.random.normal(k2, (m, n), dtype=jnp.float32)         # jacobian
    R = 0.1 * jnp.eye(m, dtype=jnp.float32)
    KG = P @ H.T @ jnp.linalg.inv(H @ P @ H.T + R)               # Kalman gain

    Lb = jax.random.normal(k3, (B, n, n), dtype=jnp.float32)
    P_post = jnp.einsum("bij,bkj->bik", Lb, Lb) + n * jnp.eye(n, dtype=jnp.float32)

    B2 = 20  # exercises identity padding + multi-step grid accumulation
    Lb2 = jax.random.normal(k4, (B2, n, n), dtype=jnp.float32)
    P_post2 = jnp.einsum("bij,bkj->bik", Lb2, Lb2) + n * jnp.eye(n, dtype=jnp.float32)

    args_single = {"m2x_prior": P, "KG": KG, "jac_H": H}
    args_seq = {"m2x_posterior": P_post}
    args_seq2 = {"m2x_posterior": P_post2}

    out_single = jax.block_until_ready(information_theoretic_cost(args_single, "single"))
    out_seq = jax.block_until_ready(information_theoretic_cost(args_seq, "sequential"))
    out_seq2 = jax.block_until_ready(information_theoretic_cost(args_seq2, "sequential"))

    ref_single = _ref_single(args_single)
    ref_seq = _ref_sequential(args_seq)
    ref_seq2 = _ref_sequential(args_seq2)

    assert jnp.isfinite(out_single) and jnp.isfinite(out_seq) and jnp.isfinite(out_seq2)
    assert jnp.allclose(out_single, ref_single, rtol=1e-2, atol=1e-2), (out_single, ref_single)
    assert jnp.allclose(out_seq, ref_seq, rtol=1e-2, atol=1e-2), (out_seq, ref_seq)
    assert jnp.allclose(out_seq2, ref_seq2, rtol=1e-2, atol=1e-2), (out_seq2, ref_seq2)

    print("KERNEL_OK")
</pallas_src>

<mosaic_0001>
module attributes {stable_mosaic.version = 11 : i64} {
  func.func @_single_kernel(%arg0: memref<8x8xf32, #tpu.memory_space<vmem>>, %arg1: memref<8x4xf32, #tpu.memory_space<vmem>>, %arg2: memref<4x8xf32, #tpu.memory_space<vmem>>, %arg3: memref<1x1xf32, #tpu.memory_space<vmem>>) attributes {dimension_semantics = [], scalar_prefetch = 0 : i64, scratch_operands = 0 : i64, tpu.core_type = #tpu.core_type<tc>} {
    %c0 = arith.constant 0 : index
    %c0_0 = arith.constant 0 : index
    %0 = vector.load %arg0[%c0, %c0_0] : memref<8x8xf32, #tpu.memory_space<vmem>>, vector<8x8xf32>
    %c0_1 = arith.constant 0 : index
    %c0_2 = arith.constant 0 : index
    %1 = vector.load %arg1[%c0_1, %c0_2] : memref<8x4xf32, #tpu.memory_space<vmem>>, vector<8x4xf32>
    %c0_3 = arith.constant 0 : index
    %c0_4 = arith.constant 0 : index
    %2 = vector.load %arg2[%c0_3, %c0_4] : memref<4x8xf32, #tpu.memory_space<vmem>>, vector<4x8xf32>
    %3 = vector.extract_strided_slice %2 {offsets = [0, 0], sizes = [4, 1], strides = [1, 1]} : vector<4x8xf32> to vector<4x1xf32>
    %4 = vector.extract_strided_slice %0 {offsets = [0, 0], sizes = [1, 8], strides = [1, 1]} : vector<8x8xf32> to vector<1x8xf32>
    %5 = vector.broadcast %3 : vector<4x1xf32> to vector<4x8xf32>
    %6 = vector.broadcast %4 : vector<1x8xf32> to vector<4x8xf32>
    %7 = arith.mulf %5, %6 : vector<4x8xf32>
    %8 = vector.extract_strided_slice %2 {offsets = [0, 1], sizes = [4, 1], strides = [1, 1]} : vector<4x8xf32> to vector<4x1xf32>
    %9 = vector.extract_strided_slice %0 {offsets = [1, 0], sizes = [1, 8], strides = [1, 1]} : vector<8x8xf32> to vector<1x8xf32>
    %10 = vector.broadcast %8 : vector<4x1xf32> to vector<4x8xf32>
    %11 = vector.broadcast %9 : vector<1x8xf32> to vector<4x8xf32>
    %12 = arith.mulf %10, %11 : vector<4x8xf32>
    %13 = arith.addf %7, %12 : vector<4x8xf32>
    %14 = vector.extract_strided_slice %2 {offsets = [0, 2], sizes = [4, 1], strides = [1, 1]} : vector<4x8xf32> to vector<4x1xf32>
    %15 = vector.extract_strided_slice %0 {offsets = [2, 0], sizes = [1, 8], strides = [1, 1]} : vector<8x8xf32> to vector<1x8xf32>
    %16 = vector.broadcast %14 : vector<4x1xf32> to vector<4x8xf32>
    %17 = vector.broadcast %15 : vector<1x8xf32> to vector<4x8xf32>
    %18 = arith.mulf %16, %17 : vector<4x8xf32>
    %19 = arith.addf %13, %18 : vector<4x8xf32>
    %20 = vector.extract_strided_slice %2 {offsets = [0, 3], sizes = [4, 1], strides = [1, 1]} : vector<4x8xf32> to vector<4x1xf32>
    %21 = vector.extract_strided_slice %0 {offsets = [3, 0], sizes = [1, 8], strides = [1, 1]} : vector<8x8xf32> to vector<1x8xf32>
    %22 = vector.broadcast %20 : vector<4x1xf32> to vector<4x8xf32>
    %23 = vector.broadcast %21 : vector<1x8xf32> to vector<4x8xf32>
    %24 = arith.mulf %22, %23 : vector<4x8xf32>
    %25 = arith.addf %19, %24 : vector<4x8xf32>
    %26 = vector.extract_strided_slice %2 {offsets = [0, 4], sizes = [4, 1], strides = [1, 1]} : vector<4x8xf32> to vector<4x1xf32>
    %27 = vector.extract_strided_slice %0 {offsets = [4, 0], sizes = [1, 8], strides = [1, 1]} : vector<8x8xf32> to vector<1x8xf32>
    %28 = vector.broadcast %26 : vector<4x1xf32> to vector<4x8xf32>
    %29 = vector.broadcast %27 : vector<1x8xf32> to vector<4x8xf32>
    %30 = arith.mulf %28, %29 : vector<4x8xf32>
    %31 = arith.addf %25, %30 : vector<4x8xf32>
    %32 = vector.extract_strided_slice %2 {offsets = [0, 5], sizes = [4, 1], strides = [1, 1]} : vector<4x8xf32> to vector<4x1xf32>
    %33 = vector.extract_strided_slice %0 {offsets = [5, 0], sizes = [1, 8], strides = [1, 1]} : vector<8x8xf32> to vector<1x8xf32>
    %34 = vector.broadcast %32 : vector<4x1xf32> to vector<4x8xf32>
    %35 = vector.broadcast %33 : vector<1x8xf32> to vector<4x8xf32>
    %36 = arith.mulf %34, %35 : vector<4x8xf32>
    %37 = arith.addf %31, %36 : vector<4x8xf32>
    %38 = vector.extract_strided_slice %2 {offsets = [0, 6], sizes = [4, 1], strides = [1, 1]} : vector<4x8xf32> to vector<4x1xf32>
    %39 = vector.extract_strided_slice %0 {offsets = [6, 0], sizes = [1, 8], strides = [1, 1]} : vector<8x8xf32> to vector<1x8xf32>
    %40 = vector.broadcast %38 : vector<4x1xf32> to vector<4x8xf32>
    %41 = vector.broadcast %39 : vector<1x8xf32> to vector<4x8xf32>
    %42 = arith.mulf %40, %41 : vector<4x8xf32>
    %43 = arith.addf %37, %42 : vector<4x8xf32>
    %44 = vector.extract_strided_slice %2 {offsets = [0, 7], sizes = [4, 1], strides = [1, 1]} : vector<4x8xf32> to vector<4x1xf32>
    %45 = vector.extract_strided_slice %0 {offsets = [7, 0], sizes = [1, 8], strides = [1, 1]} : vector<8x8xf32> to vector<1x8xf32>
    %46 = vector.broadcast %44 : vector<4x1xf32> to vector<4x8xf32>
    %47 = vector.broadcast %45 : vector<1x8xf32> to vector<4x8xf32>
    %48 = arith.mulf %46, %47 : vector<4x8xf32>
    %49 = arith.addf %43, %48 : vector<4x8xf32>
    %50 = vector.extract_strided_slice %1 {offsets = [0, 0], sizes = [8, 1], strides = [1, 1]} : vector<8x4xf32> to vector<8x1xf32>
    %51 = vector.extract_strided_slice %49 {offsets = [0, 0], sizes = [1, 8], strides = [1, 1]} : vector<4x8xf32> to vector<1x8xf32>
    %52 = vector.broadcast %50 : vector<8x1xf32> to vector<8x8xf32>
    %53 = vector.broadcast %51 : vector<1x8xf32> to vector<8x8xf32>
    %54 = arith.mulf %52, %53 : vector<8x8xf32>
    %55 = vector.extract_strided_slice %1 {offsets = [0, 1], sizes = [8, 1], strides = [1, 1]} : vector<8x4xf32> to vector<8x1xf32>
    %56 = vector.extract_strided_slice %49 {offsets = [1, 0], sizes = [1, 8], strides = [1, 1]} : vector<4x8xf32> to vector<1x8xf32>
    %57 = vector.broadcast %55 : vector<8x1xf32> to vector<8x8xf32>
    %58 = vector.broadcast %56 : vector<1x8xf32> to vector<8x8xf32>
    %59 = arith.mulf %57, %58 : vector<8x8xf32>
    %60 = arith.addf %54, %59 : vector<8x8xf32>
    %61 = vector.extract_strided_slice %1 {offsets = [0, 2], sizes = [8, 1], strides = [1, 1]} : vector<8x4xf32> to vector<8x1xf32>
    %62 = vector.extract_strided_slice %49 {offsets = [2, 0], sizes = [1, 8], strides = [1, 1]} : vector<4x8xf32> to vector<1x8xf32>
    %63 = vector.broadcast %61 : vector<8x1xf32> to vector<8x8xf32>
    %64 = vector.broadcast %62 : vector<1x8xf32> to vector<8x8xf32>
    %65 = arith.mulf %63, %64 : vector<8x8xf32>
    %66 = arith.addf %60, %65 : vector<8x8xf32>
    %67 = vector.extract_strided_slice %1 {offsets = [0, 3], sizes = [8, 1], strides = [1, 1]} : vector<8x4xf32> to vector<8x1xf32>
    %68 = vector.extract_strided_slice %49 {offsets = [3, 0], sizes = [1, 8], strides = [1, 1]} : vector<4x8xf32> to vector<1x8xf32>
    %69 = vector.broadcast %67 : vector<8x1xf32> to vector<8x8xf32>
    %70 = vector.broadcast %68 : vector<1x8xf32> to vector<8x8xf32>
    %71 = arith.mulf %69, %70 : vector<8x8xf32>
    %72 = arith.addf %66, %71 : vector<8x8xf32>
    %73 = arith.subf %0, %72 : vector<8x8xf32>
    %74 = tpu.iota {dimensions = array<i32: 0>} : vector<8x8xi32>
    %75 = tpu.iota {dimensions = array<i32: 1>} : vector<8x8xi32>
    %76 = vector.extract_strided_slice %73 {offsets = [7, 7], sizes = [1, 1], strides = [1, 1]} : vector<8x8xf32> to vector<1x1xf32>
    %77 = vector.extract_strided_slice %73 {offsets = [0, 7], sizes = [8, 1], strides = [1, 1]} : vector<8x8xf32> to vector<8x1xf32>
    %78 = vector.extract_strided_slice %73 {offsets = [7, 0], sizes = [1, 8], strides = [1, 1]} : vector<8x8xf32> to vector<1x8xf32>
    %cst = arith.constant 1.000000e+00 : f32
    %79 = vector.broadcast %cst : f32 to vector<1x1xf32>
    %80 = arith.divf %79, %76 : vector<1x1xf32>
    %81 = vector.broadcast %80 : vector<1x1xf32> to vector<1x8xf32>
    %82 = arith.mulf %78, %81 : vector<1x8xf32>
    %83 = vector.broadcast %77 : vector<8x1xf32> to vector<8x8xf32>
    %84 = vector.broadcast %82 : vector<1x8xf32> to vector<8x8xf32>
    %85 = arith.mulf %83, %84 : vector<8x8xf32>
    %86 = arith.subf %73, %85 : vector<8x8xf32>
    %c7_i32 = arith.constant 7 : i32
    %87 = vector.broadcast %c7_i32 : i32 to vector<8x8xi32>
    %88 = arith.cmpi slt, %74, %87 : vector<8x8xi32>
    %89 = arith.select %88, %86, %73 : vector<8x8xi1>, vector<8x8xf32>
    %90 = vector.extract_strided_slice %89 {offsets = [6, 6], sizes = [1, 1], strides = [1, 1]} : vector<8x8xf32> to vector<1x1xf32>
    %91 = vector.extract_strided_slice %89 {offsets = [0, 6], sizes = [8, 1], strides = [1, 1]} : vector<8x8xf32> to vector<8x1xf32>
    %92 = vector.extract_strided_slice %89 {offsets = [6, 0], sizes = [1, 8], strides = [1, 1]} : vector<8x8xf32> to vector<1x8xf32>
    %cst_5 = arith.constant 1.000000e+00 : f32
    %93 = vector.broadcast %cst_5 : f32 to vector<1x1xf32>
    %94 = arith.divf %93, %90 : vector<1x1xf32>
    %95 = vector.broadcast %94 : vector<1x1xf32> to vector<1x8xf32>
    %96 = arith.mulf %92, %95 : vector<1x8xf32>
    %97 = vector.broadcast %91 : vector<8x1xf32> to vector<8x8xf32>
    %98 = vector.broadcast %96 : vector<1x8xf32> to vector<8x8xf32>
    %99 = arith.mulf %97, %98 : vector<8x8xf32>
    %100 = arith.subf %89, %99 : vector<8x8xf32>
    %c6_i32 = arith.constant 6 : i32
    %101 = vector.broadcast %c6_i32 : i32 to vector<8x8xi32>
    %102 = arith.cmpi slt, %74, %101 : vector<8x8xi32>
    %103 = arith.select %102, %100, %89 : vector<8x8xi1>, vector<8x8xf32>
    %104 = vector.extract_strided_slice %103 {offsets = [5, 5], sizes = [1, 1], strides = [1, 1]} : vector<8x8xf32> to vector<1x1xf32>
    %105 = vector.extract_strided_slice %103 {offsets = [0, 5], sizes = [8, 1], strides = [1, 1]} : vector<8x8xf32> to vector<8x1xf32>
    %106 = vector.extract_strided_slice %103 {offsets = [5, 0], sizes = [1, 8], strides = [1, 1]} : vector<8x8xf32> to vector<1x8xf32>
    %cst_6 = arith.constant 1.000000e+00 : f32
    %107 = vector.broadcast %cst_6 : f32 to vector<1x1xf32>
    %108 = arith.divf %107, %104 : vector<1x1xf32>
    %109 = vector.broadcast %108 : vector<1x1xf32> to vector<1x8xf32>
    %110 = arith.mulf %106, %109 : vector<1x8xf32>
    %111 = vector.broadcast %105 : vector<8x1xf32> to vector<8x8xf32>
    %112 = vector.broadcast %110 : vector<1x8xf32> to vector<8x8xf32>
    %113 = arith.mulf %111, %112 : vector<8x8xf32>
    %114 = arith.subf %103, %113 : vector<8x8xf32>
    %c5_i32 = arith.constant 5 : i32
    %115 = vector.broadcast %c5_i32 : i32 to vector<8x8xi32>
    %116 = arith.cmpi slt, %74, %115 : vector<8x8xi32>
    %117 = arith.select %116, %114, %103 : vector<8x8xi1>, vector<8x8xf32>
    %118 = vector.extract_strided_slice %117 {offsets = [4, 4], sizes = [1, 1], strides = [1, 1]} : vector<8x8xf32> to vector<1x1xf32>
    %119 = vector.extract_strided_slice %117 {offsets = [0, 4], sizes = [8, 1], strides = [1, 1]} : vector<8x8xf32> to vector<8x1xf32>
    %120 = vector.extract_strided_slice %117 {offsets = [4, 0], sizes = [1, 8], strides = [1, 1]} : vector<8x8xf32> to vector<1x8xf32>
    %cst_7 = arith.constant 1.000000e+00 : f32
    %121 = vector.broadcast %cst_7 : f32 to vector<1x1xf32>
    %122 = arith.divf %121, %118 : vector<1x1xf32>
    %123 = vector.broadcast %122 : vector<1x1xf32> to vector<1x8xf32>
    %124 = arith.mulf %120, %123 : vector<1x8xf32>
    %125 = vector.broadcast %119 : vector<8x1xf32> to vector<8x8xf32>
    %126 = vector.broadcast %124 : vector<1x8xf32> to vector<8x8xf32>
    %127 = arith.mulf %125, %126 : vector<8x8xf32>
    %128 = arith.subf %117, %127 : vector<8x8xf32>
    %c4_i32 = arith.constant 4 : i32
    %129 = vector.broadcast %c4_i32 : i32 to vector<8x8xi32>
    %130 = arith.cmpi slt, %74, %129 : vector<8x8xi32>
    %131 = arith.select %130, %128, %117 : vector<8x8xi1>, vector<8x8xf32>
    %132 = vector.extract_strided_slice %131 {offsets = [3, 3], sizes = [1, 1], strides = [1, 1]} : vector<8x8xf32> to vector<1x1xf32>
    %133 = vector.extract_strided_slice %131 {offsets = [0, 3], sizes = [8, 1], strides = [1, 1]} : vector<8x8xf32> to vector<8x1xf32>
    %134 = vector.extract_strided_slice %131 {offsets = [3, 0], sizes = [1, 8], strides = [1, 1]} : vector<8x8xf32> to vector<1x8xf32>
    %cst_8 = arith.constant 1.000000e+00 : f32
    %135 = vector.broadcast %cst_8 : f32 to vector<1x1xf32>
    %136 = arith.divf %135, %132 : vector<1x1xf32>
    %137 = vector.broadcast %136 : vector<1x1xf32> to vector<1x8xf32>
    %138 = arith.mulf %134, %137 : vector<1x8xf32>
    %139 = vector.broadcast %133 : vector<8x1xf32> to vector<8x8xf32>
    %140 = vector.broadcast %138 : vector<1x8xf32> to vector<8x8xf32>
    %141 = arith.mulf %139, %140 : vector<8x8xf32>
    %142 = arith.subf %131, %141 : vector<8x8xf32>
    %c3_i32 = arith.constant 3 : i32
    %143 = vector.broadcast %c3_i32 : i32 to vector<8x8xi32>
    %144 = arith.cmpi slt, %74, %143 : vector<8x8xi32>
    %145 = arith.select %144, %142, %131 : vector<8x8xi1>, vector<8x8xf32>
    %146 = vector.extract_strided_slice %145 {offsets = [2, 2], sizes = [1, 1], strides = [1, 1]} : vector<8x8xf32> to vector<1x1xf32>
    %147 = vector.extract_strided_slice %145 {offsets = [0, 2], sizes = [8, 1], strides = [1, 1]} : vector<8x8xf32> to vector<8x1xf32>
    %148 = vector.extract_strided_slice %145 {offsets = [2, 0], sizes = [1, 8], strides = [1, 1]} : vector<8x8xf32> to vector<1x8xf32>
    %cst_9 = arith.constant 1.000000e+00 : f32
    %149 = vector.broadcast %cst_9 : f32 to vector<1x1xf32>
    %150 = arith.divf %149, %146 : vector<1x1xf32>
    %151 = vector.broadcast %150 : vector<1x1xf32> to vector<1x8xf32>
    %152 = arith.mulf %148, %151 : vector<1x8xf32>
    %153 = vector.broadcast %147 : vector<8x1xf32> to vector<8x8xf32>
    %154 = vector.broadcast %152 : vector<1x8xf32> to vector<8x8xf32>
    %155 = arith.mulf %153, %154 : vector<8x8xf32>
    %156 = arith.subf %145, %155 : vector<8x8xf32>
    %c2_i32 = arith.constant 2 : i32
    %157 = vector.broadcast %c2_i32 : i32 to vector<8x8xi32>
    %158 = arith.cmpi slt, %74, %157 : vector<8x8xi32>
    %159 = arith.select %158, %156, %145 : vector<8x8xi1>, vector<8x8xf32>
    %160 = vector.extract_strided_slice %159 {offsets = [1, 1], sizes = [1, 1], strides = [1, 1]} : vector<8x8xf32> to vector<1x1xf32>
    %161 = vector.extract_strided_slice %159 {offsets = [0, 1], sizes = [8, 1], strides = [1, 1]} : vector<8x8xf32> to vector<8x1xf32>
    %162 = vector.extract_strided_slice %159 {offsets = [1, 0], sizes = [1, 8], strides = [1, 1]} : vector<8x8xf32> to vector<1x8xf32>
    %cst_10 = arith.constant 1.000000e+00 : f32
    %163 = vector.broadcast %cst_10 : f32 to vector<1x1xf32>
    %164 = arith.divf %163, %160 : vector<1x1xf32>
    %165 = vector.broadcast %164 : vector<1x1xf32> to vector<1x8xf32>
    %166 = arith.mulf %162, %165 : vector<1x8xf32>
    %167 = vector.broadcast %161 : vector<8x1xf32> to vector<8x8xf32>
    %168 = vector.broadcast %166 : vector<1x8xf32> to vector<8x8xf32>
    %169 = arith.mulf %167, %168 : vector<8x8xf32>
    %170 = arith.subf %159, %169 : vector<8x8xf32>
    %c1_i32 = arith.constant 1 : i32
    %171 = vector.broadcast %c1_i32 : i32 to vector<8x8xi32>
    %172 = arith.cmpi slt, %74, %171 : vector<8x8xi32>
    %173 = arith.select %172, %170, %159 : vector<8x8xi1>, vector<8x8xf32>
    %174 = arith.cmpi eq, %74, %75 : vector<8x8xi32>
    %c3_i32_11 = arith.constant 3 : i32
    %175 = vector.broadcast %c3_i32_11 : i32 to vector<8x8xi32>
    %176 = arith.cmpi slt, %74, %175 : vector<8x8xi32>
    %177 = arith.andi %174, %176 : vector<8x8xi1>
    %cst_12 = arith.constant 1.000000e+00 : f32
    %178 = vector.broadcast %cst_12 : f32 to vector<8x8xf32>
    %179 = arith.select %177, %173, %178 : vector<8x8xi1>, vector<8x8xf32>
    %180 = math.log %179 : vector<8x8xf32>
    %181 = vector.shape_cast %180 : vector<8x8xf32> to vector<1x8x8xf32>
    %cst_13 = arith.constant dense<0.000000e+00> : vector<1xf32>
    %182 = vector.multi_reduction <add>, %181, %cst_13 [1, 2] : vector<1x8x8xf32> to vector<1xf32>
    %183 = vector.shape_cast %182 : vector<1xf32> to vector<1x1x1xf32>
    %184 = vector.extract %183[0, 0, 0] : f32 from vector<1x1x1xf32>
    %185 = vector.broadcast %184 : f32 to vector<1x1xf32>
    %c0_14 = arith.constant 0 : index
    %c0_15 = arith.constant 0 : index
    %186 = vector.load %arg3[%c0_14, %c0_15] : memref<1x1xf32, #tpu.memory_space<vmem>>, vector<1x1xf32>
    tpu.vector_store %arg3[%c0_14, %c0_15], %185 {strides = array<i32>} : memref<1x1xf32, #tpu.memory_space<vmem>>, vector<1x1xf32>,
    return
  }
}

</mosaic_0001>

<bundles_post_ra>
// kernel: tpu_custom_call.1
= control target key start
LH: loop header
LB: loop body
LE: loop exit
PB: predicated region body
PF: predicated region fallthrough
CT: control target
= control target key end

     0   :  { %v398_v1 = vmov 2   ;;  %v399_v2 = vmov 0   ;;  %s515_s0 = inlined_call_operand.vmem [shape: f32[8,8], index: 0, kind: input, shape index: {}]   ;;  %s516_s1 = inlined_call_operand.vmem [shape: f32[8,4], index: 1, kind: input, shape index: {}]   ;;  %s517_s2 = inlined_call_operand.vmem [shape: f32[4,8], index: 2, kind: input, shape index: {}]   ;;  %s518_s3 = inlined_call_operand.hbm [shape: f32[1,1], index: 3, kind: output, shape index: {}]  }
   0x1   :  { %v17_v0 = vld [vmem:[%s517_s2] sm:$0xf]  ;;  %336 = vset.pattern.permute.xlu1 %v398_v1  ;;  %334 = vset.pattern.permute.xlu0 %v399_v2 }
   0x2   :  { %39 = vperm.xlu1 %336, %v17_v0   ;;  %20 = vperm.xlu0 %334, %v17_v0  }
   0x3   :  { %8 = vsyncpa [#allocation3], 0  ;;  %v400_v3 = vmov 3   ;;  %v401_v4 = vmov 1   ;;  %v402_v5 = vmov 4   ;;  %v403_v6 = vmov 5  }
   0x4   :  { %v16_v7 = vld [vmem:[%s516_s1] sm:$0xff]  ;;  %v404_v8 = vmov 6   ;;  %v405_v9 = vmov 7   ;;  %v23_v10 = vlaneseq  ;;  %vm295_vm9 = vcmask 64512  }
   0x5   :  { %v15_v14 = vld [vmem:[%s515_s0] sm:$0xff]  ;;  %s406_s0 = smov [#allocation2]   ;;  %vm307_vm10 = vcmask 0  }
   0x6   :  { %337 = vset.pattern.permute.xlu1 %v400_v3  ;;  %335 = vset.pattern.permute.xlu0 %v401_v4  ;;  %v444_v11 = vshrl.u32 %v23_v10, 7  ;;  %s315_s16 = sshll.u32 %s406_s0, 4  ;;  %s316_s16 = int_to_ptr.vmem [resolvable:$true] %s315_s16 }
   0x7   :  { %49 = vperm.xlu1 %337, %v17_v0   ;;  %29 = vperm.xlu0 %335, %v17_v0   ;;  %s374_s18 = scalar_lea.vmem %s316_s16, 16  ;;  %s378_s19 = scalar_lea.vmem %s316_s16, 32 }
   0x8   :  { %v25_v12 = vsub.s32 0, %v444_v11  ;;  %v448_v13 = vsub.s32 1, %v444_v11  ;;  %v454_v15 = vsub.s32 2, %v444_v11  ;;  %v457_v19 = vsub.s32 3, %v444_v11  ;;  %p375_p0 = scmp.ne.s32.totalorder %s316_s16, %s374_s18  ;;  %p379_p1 = scmp.lt.s32.totalorder %s316_s16, %s316_s16 }
   0x9   :  { %v64_v21 = vsub.s32 4, %v444_v11  ;;  %v74_v26 = vsub.s32 5, %v444_v11  ;;  %v84_v33 = vsub.s32 6, %v444_v11  ;;  %v94_v42 = vsub.s32 7, %v444_v11  ;;  %p380_p2 = scmp.lt.s32.totalorder %s378_s19, %s374_s18 }
   0xa   :  { %v26_v18 = vrot.slane %v15_v14, %v25_v12  ;;  %v35_v20 = vrot.slane %v15_v14, %v448_v13  ;;  %v45_v22 = vrot.slane %v15_v14, %v454_v15  ;;  %v55_v27 = vrot.slane %v15_v14, %v457_v19 }
   0xb   :  { %338 = vset.pattern.permute.xlu1 %v402_v5  ;;  %339 = vset.pattern.permute.xlu0 %v403_v6  ;;  %v65_v29 = vrot.slane %v15_v14, %v64_v21  ;;  %v75_v32 = vrot.slane %v15_v14, %v74_v26  ;;  %v85_v41 = vrot.slane %v15_v14, %v84_v33  ;;  %vm162_vm0 = vcmp.lt.s32.totalorder %v444_v11, 7  ;;  %p381_p3 = por %p380_p2, %p379_p1 }
   0xc   :  { %59 = vperm.xlu1 %338, %v17_v0   ;;  %69 = vperm.xlu0 %339, %v17_v0   ;;  %v95_v47 = vrot.slane %v15_v14, %v94_v42  ;;  %vm183_vm1 = vcmp.lt.s32.totalorder %v444_v11, 6  ;;  %vm204_vm2 = vcmp.lt.s32.totalorder %v444_v11, 5  ;;  %vm225_vm3 = vcmp.lt.s32.totalorder %v444_v11, 4 }
   0xd   :  { %vm246_vm4 = vcmp.lt.s32.totalorder %v444_v11, 3  ;;  %vm267_vm5 = vcmp.lt.s32.totalorder %v444_v11, 2  ;;  %vm288_vm7 = vcmp.lt.s32.totalorder %v444_v11, 1  ;;  %p382_p4 = pnand %p381_p3, %p375_p0 }
  0x10   :  { %340 = vset.pattern.permute.xlu1 %v404_v8  ;;  %342 = vset.pattern.permute.xlu0 %v399_v2 }
  0x11   :  { %79 = vperm.xlu1 %340, %v17_v0   ;;  %100 = vperm.xlu0 %342, %v16_v7  }
  0x15   :  { %341 = vset.pattern.permute.xlu1 %v405_v9  ;;  %345 = vset.pattern.permute.xlu0 %v400_v3 }
  0x16   :  { %89 = vperm.xlu1 %341, %v17_v0   ;;  %129 = vperm.xlu0 %345, %v16_v7  }
  0x1a   :  { %343 = vset.pattern.permute.xlu1 %v401_v4  ;;  %347 = vset.pattern.permute.xlu0 %v404_v8 }
  0x1b   :  { %109 = vperm.xlu1 %343, %v16_v7  }
  0x1f   :  { %344 = vset.pattern.permute.xlu1 %v398_v1 }
  0x20   :  { %119 = vperm.xlu1 %344, %v16_v7  }
  0x24   :  { %346 = vset.pattern.permute.xlu1 %v405_v9 }
  0x81   :  { %v40_v16 = vpop.permute.xlu1 %39  ;;  %v21_v17 = vpop.permute.xlu0 %20 }
  0x82   :  { %v27_v23 = vmul.f32 %v26_v18, %v21_v17  ;;  %v46_v30 = vmul.f32 %v45_v22, %v40_v16 }
  0x86   :  { %v50_v24 = vpop.permute.xlu1 %49  ;;  %v30_v25 = vpop.permute.xlu0 %29 }
  0x87   :  { %v36_v28 = vmul.f32 %v35_v20, %v30_v25  ;;  %v56_v34 = vmul.f32 %v55_v27, %v50_v24 }
  0x89   :  { %v37_v31 = vadd.f32 %v36_v28, %v27_v23 }
  0x8b   :  { %v47_v35 = vadd.f32 %v46_v30, %v37_v31  ;;  %v60_v36 = vpop.permute.xlu1 %59  ;;  %v70_v37 = vpop.permute.xlu0 %69 }
  0x8c   :  { %v66_v38 = vmul.f32 %v65_v29, %v60_v36  ;;  %v76_v40 = vmul.f32 %v75_v32, %v70_v37 }
  0x8d   :  { %v57_v39 = vadd.f32 %v56_v34, %v47_v35 }
  0x8f   :  { %v67_v43 = vadd.f32 %v66_v38, %v57_v39 }
  0x90   :  { %v80_v44 = vpop.permute.xlu1 %79  ;;  %v101_v52 = vpop.permute.xlu0 %100 }
  0x91   :  { %v77_v45 = vadd.f32 %v76_v40, %v67_v43  ;;  %v86_v46 = vmul.f32 %v85_v41, %v80_v44 }
  0x93   :  { %v87_v49 = vadd.f32 %v86_v46, %v77_v45 }
  0x95   :  { %v90_v48 = vpop.permute.xlu1 %89  ;;  %v130_v60 = vpop.permute.xlu0 %129 }
  0x96   :  { %v96_v50 = vmul.f32 %v95_v47, %v90_v48 }
  0x98   :  { %v97_v51 = vadd.f32 %v96_v50, %v87_v49 }
  0x9a   :  { %v106_v53 = vrot.slane %v97_v51, %v25_v12  ;;  %v110_v54 = vpop.permute.xlu1 %109  ;;  %v115_v55 = vrot.slane %v97_v51, %v448_v13  ;;  %v135_v58 = vrot.slane %v97_v51, %v457_v19  ;;  %v125_v59 = vrot.slane %v97_v51, %v454_v15 }
  0x9c   :  { %v107_v56 = vmul.f32 %v106_v53, %v101_v52  ;;  %v116_v57 = vmul.f32 %v115_v55, %v110_v54  ;;  %v136_v0 = vmul.f32 %v135_v58, %v130_v60 }
  0x9e   :  { %v117_v62 = vadd.f32 %v116_v57, %v107_v56 }
  0x9f   :  { %v120_v61 = vpop.permute.xlu1 %119 }
  0xa0   :  { %v126_v63 = vmul.f32 %v125_v59, %v120_v61  ;;  %v142_v59 = vand.u32 127, %v23_v10 }
  0xa2   :  { %v127_v2 = vadd.f32 %v126_v63, %v117_v62  ;;  %vm290_vm6 = vcmp.eq.s32.totalorder %v444_v11, %v142_v59 }
  0xa3   :  { %vm291_vm8 = vmand %vm290_vm6, %vm246_vm4 }
  0xa4   :  { %v137_v7 = vadd.f32 %v136_v0, %v127_v2 }
  0xa6   :  { %v138_v9 = vsub.f32 %v15_v14, %v137_v7 }
  0xa8   :  { %358 = vrcp.f32 %v138_v9 }
  0xb2   :  { %v359_v16 = vpop.eup %358 }
  0xb3   :  { %147 = vperm.xlu1 %346, %v359_v16  }
  0xb7   :  { %153 = vperm.xlu1 %346, %v138_v9  }
  0xbb   :  { %348 = vset.pattern.permute.xlu1 %v404_v8 }
 0x132   :  { %v148_v12 = vpop.permute.xlu1 %147 }
 0x133   :  { %v150_v17 = vmul.f32 %v148_v12, %v138_v9 }
 0x135   :  { %v159_v18 = vrot.slane %v150_v17, %v94_v42 }
 0x136   :  { %v154_v20 = vpop.permute.xlu1 %153 }
 0x137   :  { %v160_v22 = vmul.f32 %v159_v18, %v154_v20 }
 0x139   :  { %v161_v23 = vsub.f32 %v138_v9, %v160_v22 }
 0x13b   :  { %v163_v24 = vsel %vm162_vm0, %v161_v23, %v138_v9 }
 0x13c   :  { %174 = vperm.xlu1 %348, %v163_v24   ;;  %360 = vrcp.f32 %v163_v24 }
 0x140   :  { %349 = vset.pattern.permute.xlu1 %v403_v6 }
 0x146   :  { %v361_v14 = vpop.eup %360 }
 0x147   :  { %168 = vperm.xlu0 %347, %v361_v14  }
 0x14b   :  { %350 = vset.pattern.permute.xlu0 %v403_v6 }
 0x1bb   :  { %v175_v28 = vpop.permute.xlu1 %174 }
 0x1c6   :  { %v169_v25 = vpop.permute.xlu0 %168 }
 0x1c7   :  { %v171_v27 = vmul.f32 %v169_v25, %v163_v24 }
 0x1c9   :  { %v180_v8 = vrot.slane %v171_v27, %v84_v33 }
 0x1cb   :  { %v181_v29 = vmul.f32 %v180_v8, %v175_v28 }
 0x1cd   :  { %v182_v30 = vsub.f32 %v163_v24, %v181_v29 }
 0x1cf   :  { %v184_v31 = vsel %vm183_vm1, %v182_v30, %v163_v24 }
 0x1d0   :  { %195 = vperm.xlu0 %350, %v184_v31   ;;  %362 = vrcp.f32 %v184_v31 }
 0x1d4   :  { %352 = vset.pattern.permute.xlu0 %v400_v3 }
 0x1da   :  { %v363_v32 = vpop.eup %362 }
 0x1db   :  { %189 = vperm.xlu1 %349, %v363_v32  }
 0x1df   :  { %351 = vset.pattern.permute.xlu1 %v402_v5 }
 0x24f   :  { %v196_v33 = vpop.permute.xlu0 %195 }
 0x25a   :  { %v190_v34 = vpop.permute.xlu1 %189 }
 0x25b   :  { %v192_v35 = vmul.f32 %v190_v34, %v184_v31 }
 0x25d   :  { %v201_v6 = vrot.slane %v192_v35, %v74_v26 }
 0x25f   :  { %v202_v36 = vmul.f32 %v201_v6, %v196_v33 }
 0x261   :  { %v203_v37 = vsub.f32 %v184_v31, %v202_v36 }
 0x263   :  { %v205_v38 = vsel %vm204_vm2, %v203_v37, %v184_v31 }
 0x264   :  { %364 = vrcp.f32 %v205_v38 }
 0x26e   :  { %v365_v39 = vpop.eup %364 }
 0x26f   :  { %210 = vperm.xlu1 %351, %v365_v39  }
 0x273   :  { %216 = vperm.xlu1 %351, %v205_v38  }
 0x277   :  { %353 = vset.pattern.permute.xlu1 %v400_v3 }
 0x2ee   :  { %v211_v40 = vpop.permute.xlu1 %210 }
 0x2ef   :  { %v213_v41 = vmul.f32 %v211_v40, %v205_v38 }
 0x2f1   :  { %v222_v5 = vrot.slane %v213_v41, %v64_v21 }
 0x2f2   :  { %v217_v42 = vpop.permute.xlu1 %216 }
 0x2f3   :  { %v223_v43 = vmul.f32 %v222_v5, %v217_v42 }
 0x2f5   :  { %v224_v26 = vsub.f32 %v205_v38, %v223_v43 }
 0x2f7   :  { %v226_v44 = vsel %vm225_vm3, %v224_v26, %v205_v38 }
 0x2f8   :  { %237 = vperm.xlu1 %353, %v226_v44   ;;  %366 = vrcp.f32 %v226_v44 }
 0x2fc   :  { %354 = vset.pattern.permute.xlu1 %v398_v1 }
 0x302   :  { %v367_v45 = vpop.eup %366 }
 0x303   :  { %231 = vperm.xlu0 %352, %v367_v45  }
 0x307   :  { %355 = vset.pattern.permute.xlu0 %v398_v1 }
 0x377   :  { %v238_v48 = vpop.permute.xlu1 %237 }
 0x382   :  { %v232_v3 = vpop.permute.xlu0 %231 }
 0x383   :  { %v234_v46 = vmul.f32 %v232_v3, %v226_v44 }
 0x385   :  { %v243_v47 = vrot.slane %v234_v46, %v457_v19 }
 0x387   :  { %v244_v21 = vmul.f32 %v243_v47, %v238_v48 }
 0x389   :  { %v245_v49 = vsub.f32 %v226_v44, %v244_v21 }
 0x38b   :  { %v247_v50 = vsel %vm246_vm4, %v245_v49, %v226_v44 }
 0x38c   :  { %258 = vperm.xlu0 %355, %v247_v50   ;;  %368 = vrcp.f32 %v247_v50 }
 0x390   :  { %357 = vset.pattern.permute.xlu0 %v401_v4 }
 0x396   :  { %v369_v51 = vpop.eup %368 }
 0x397   :  { %252 = vperm.xlu1 %354, %v369_v51  }
 0x39b   :  { %356 = vset.pattern.permute.xlu1 %v401_v4 }
 0x40b   :  { %v259_v53 = vpop.permute.xlu0 %258 }
 0x416   :  { %v253_v1 = vpop.permute.xlu1 %252 }
 0x417   :  { %v255_v52 = vmul.f32 %v253_v1, %v247_v50 }
 0x419   :  { %v264_v19 = vrot.slane %v255_v52, %v454_v15 }
 0x41b   :  { %v265_v54 = vmul.f32 %v264_v19, %v259_v53 }
 0x41d   :  { %v266_v55 = vsub.f32 %v247_v50, %v265_v54 }
 0x41f   :  { %v268_v56 = vsel %vm267_vm5, %v266_v55, %v247_v50 }
 0x420   :  { %370 = vrcp.f32 %v268_v56 }
 0x42a   :  { %v371_v57 = vpop.eup %370 }
 0x42b   :  { %273 = vperm.xlu1 %356, %v371_v57  }
 0x42f   :  { %279 = vperm.xlu1 %356, %v268_v56  }
 0x4aa   :  { %v274_v58 = vpop.permute.xlu1 %273 }
 0x4ab   :  { %v276_v60 = vmul.f32 %v274_v58, %v268_v56 }
 0x4ad   :  { %v285_v4 = vrot.slane %v276_v60, %v448_v13 }
 0x4ae   :  { %v280_v61 = vpop.permute.xlu1 %279 }
 0x4af   :  { %v286_v15 = vmul.f32 %v285_v4, %v280_v61 }
 0x4b1   :  { %v287_v62 = vsub.f32 %v268_v56, %v286_v15 }
 0x4b3   :  { %v289_v63 = vsel %vm288_vm7, %v287_v62, %v268_v56 }
 0x4b4   :  { %v292_v0 = vsel %vm291_vm8, %v289_v63, 1.0 }
 0x4b5   :  { %372 = vlog2.f32 %v292_v0 }
 0x4bf   :  { %v373_v2 = vpop.eup %372 }
 0x4c0   :  { %v294_v7 = vmul.f32 0.6931472, %v373_v2 }
 0x4c2   :  { %v296_v10 = vsel %vm295_vm9, %v294_v7, 0.0 }
 0x4c3   :  { %297 = vadd.xlane.f32.xlu0 %v296_v10 }
 0x550   :  { %v298_v9 = vpop.xlane.xlu0 %297 }
 0x551   :  { %v299_v13 = vrot.slane %v298_v9, 4 }
 0x553   :  { %v300_v16 = vadd.f32 %v299_v13, %v298_v9 }
 0x555   :  { %v301_v12 = vrot.slane %v300_v16, 2 }
 0x557   :  { %v302_v17 = vadd.f32 %v301_v12, %v300_v16 }
 0x559   :  { %v303_v18 = vrot.slane %v302_v17, 1 }
 0x55b   :  { %v304_v20 = vadd.f32 %v303_v18, %v302_v17 }
 0x55d   :  { %323 = vpush %v304_v20 }
 0x58e   :  { %s324_s17 = spop %323 }
 0x58f   :  { %v306_v11 = vstv %s324_s17 }
 0x590   :  { %308 = vst.msk [vmem:[#allocation2] sm:$0x1] %vm307_vm10, %v306_v11 }
 0x591   :  { %385 = shalt.err (!%p382_p4)
}
 0x592   :  { %s386_s22 = scalar_lea.hbm %s518_s3, 16 }
 0x593   :  { %p387_p5 = scmp.ne.s32.totalorder %s518_s3, %s386_s22  ;;  %p390_p6 = scmp.lt.u32.totalorder %s386_s22, %s518_s3 }
 0x595   :  { %p392_p7 = pnand %p390_p6, %p387_p5 }
 0x597   :  { %395 = shalt.err (!%p392_p7)
}
 0x598   :  { %318 = dma.vmem_to_hbm [thread:$0]  %s316_s16, 16, %s518_s3, [#allocation3]  }
 0x599   :  { %396 = dma.done.wait [#allocation3], 16  }
 0x59a   :  { %397 = vsyncadd [#allocation3], 4294967280 }
 0x59b   :  { %322 = vsyncpa [#allocation3], 1 }

</bundles_post_ra>
